<compile_context>
chip_gen: v7x
topology: tpu7x:2x2x1
jax: 0.10.0
libtpu: 0.0.40
codegen_flags: <defaults>
</compile_context>

<pallas_src>
import jax
import jax.numpy as jnp
from jax.experimental import pallas as pl
from jax.experimental.pallas import tpu as pltpu

LANE = 128
MAX_SINGLE_K = 2048      # largest K handled as a single reduction step
MAX_TILE_K = 2048        # K tile for the multi-step (accumulator) path


def _fold_to_lane_chunks(prod, tile_k):
    """Fold the last (lane) dim of `prod` (tile_b, 128, tile_k) down to 128 lanes
    using pure element-wise VPU adds (128-aligned lane slices are vreg selects)."""
    folded = prod[..., :LANE]
    for c in range(1, tile_k // LANE):
        folded = folded + prod[..., c * LANE:(c + 1) * LANE]
    return folded


def _make_single_step_kernel(K):
    """K fits one block: no k grid axis, no scratch, direct store."""
    def kernel(y_ref, beta_ref, o_ref):
        y = y_ref[...].astype(jnp.float32)        # (tile_b, 128, K)
        b = beta_ref[...].astype(jnp.float32)     # (1, 1, K)
        prod = y * b
        if K > LANE and K % LANE == 0:
            prod = _fold_to_lane_chunks(prod, K)  # (tile_b, 128, 128), VPU only
        # Single cross-lane reduce (+ relayout) per output tile.
        o_ref[...] = jnp.sum(prod, axis=-1).astype(o_ref.dtype)
    return kernel


def _make_multi_step_kernel(tile_k):
    """Large K: accumulate 128-lane partial sums across k steps, reduce at the end."""
    def kernel(y_ref, beta_ref, o_ref, acc_ref):
        k = pl.program_id(1)

        @pl.when(k == 0)
        def _init():
            acc_ref[...] = jnp.zeros_like(acc_ref)

        y = y_ref[...].astype(jnp.float32)        # (tile_b, 128, tile_k)
        b = beta_ref[...].astype(jnp.float32)     # (1, 1, tile_k)
        # Hot loop stays on the VPU: multiply + folding adds into (tile_b,128,128).
        acc_ref[...] += _fold_to_lane_chunks(y * b, tile_k)

        @pl.when(k == pl.num_programs(1) - 1)
        def _finalize():
            # One XLU lane-reduce + sublane->lane relayout per output tile.
            o_ref[...] = jnp.sum(acc_ref[...], axis=-1).astype(o_ref.dtype)
    return kernel


def _vmem_capacity_bytes() -> int:
    try:
        info = pltpu.get_tpu_info()
        cap = getattr(info, "vmem_capacity_bytes", None)
        if cap:
            return int(cap)
    except Exception:
        pass
    return 64 * 1024 * 1024   # conservative fallback (v7x-sized VMEM)


def linear_util_forward(Y: jax.Array, beta: jax.Array) -> jax.Array:
    """Pallas equivalent of LinearUtil.forward: returns Y @ beta, shape [batch]."""
    N, K = Y.shape
    dtype = Y.dtype
    itemsize = jnp.dtype(dtype).itemsize
    beta = beta.astype(dtype)                       # matches PyTorch `self.beta.to(Y)`

    # ---- K (reduction) tiling ---------------------------------------------
    if K <= MAX_SINGLE_K:
        tile_k, k_pad, num_k = K, K, 1
    else:
        tile_k = MAX_TILE_K
        k_pad = pl.cdiv(K, tile_k) * tile_k
        num_k = k_pad // tile_k

    # ---- batch tiling: multi-MiB Y blocks sized from the chip's VMEM --------
    vmem_cap = _vmem_capacity_bytes()
    # ~12 MiB/block on 128 MiB VMEM chips (v5e/v6e), ~6 MiB on v7x (64 MiB).
    block_budget = max(1 << 20, min(12 << 20, vmem_cap // 10))
    bytes_per_group = LANE * tile_k * itemsize      # one 128-row group x one K tile
    tile_b_budget = max(1, block_budget // bytes_per_group)

    sub = max(8, 32 // itemsize)                    # sublane multiple for out block
    G_min = pl.cdiv(N, LANE)
    # Aim for >= 2 row tiles so the parallel axis can shard across v7x's 2 TCs.
    ideal = max(sub, (min(tile_b_budget, max(sub, pl.cdiv(G_min, 2))) // sub) * sub)

    if G_min <= sub:
        tile_b, G = G_min, G_min                    # tiny batch: one full-dim tile
    else:
        tile_b, G = 0, G_min
        if N % LANE == 0 and G_min % sub == 0:
            cand = ideal                            # largest multiple-of-`sub` divisor
            while cand >= sub:
                if G_min % cand == 0:
                    tile_b = cand
                    break
                cand -= sub
        if tile_b == 0 or tile_b * 4 < ideal:
            if G_min * bytes_per_group <= block_budget:
                tile_b, G = G_min, G_min            # one big block, no padded copy
            else:
                tile_b = ideal                      # accept one padded copy of Y
                G = pl.cdiv(G_min, tile_b) * tile_b
    num_row_tiles = G // tile_b
    n_pad = G * LANE

    # ---- pad only when unavoidable; reshape is a free view ------------------
    pad_rows, pad_k = n_pad - N, k_pad - K
    Y_use = jnp.pad(Y, ((0, pad_rows), (0, pad_k))) if (pad_rows or pad_k) else Y
    beta_use = jnp.pad(beta, (0, pad_k)) if pad_k else beta
    y3 = Y_use.reshape(G, LANE, k_pad)
    beta3 = beta_use.reshape(1, 1, k_pad)

    # ---- VMEM limit & cost hint ---------------------------------------------
    y_block_bytes = tile_b * LANE * tile_k * itemsize
    acc_bytes = tile_b * LANE * LANE * 4 if num_k > 1 else 0
    vmem_need = (2 * y_block_bytes + acc_bytes + 4 * tile_b * LANE * itemsize
                 + 4 * tile_k * itemsize + (2 << 20))
    vmem_limit = int(min(max(vmem_need, 16 << 20), 0.8 * vmem_cap))

    cost = pl.CostEstimate(flops=2 * N * K, transcendentals=0,
                           bytes_accessed=(N * K + K + N) * itemsize)

    if num_k == 1:
        out = pl.pallas_call(
            _make_single_step_kernel(k_pad),
            out_shape=jax.ShapeDtypeStruct((G, LANE), dtype),
            grid_spec=pltpu.PrefetchScalarGridSpec(
                num_scalar_prefetch=0,
                grid=(num_row_tiles,),
                in_specs=[
                    pl.BlockSpec((tile_b, LANE, k_pad), lambda i: (i, 0, 0)),
                    pl.BlockSpec((1, 1, k_pad), lambda i: (0, 0, 0)),
                ],
                out_specs=pl.BlockSpec((tile_b, LANE), lambda i: (i, 0)),
            ),
            compiler_params=pltpu.CompilerParams(
                dimension_semantics=("parallel",),
                vmem_limit_bytes=vmem_limit,
            ),
            cost_estimate=cost,
        )(y3, beta3)
    else:
        out = pl.pallas_call(
            _make_multi_step_kernel(tile_k),
            out_shape=jax.ShapeDtypeStruct((G, LANE), dtype),
            grid_spec=pltpu.PrefetchScalarGridSpec(
                num_scalar_prefetch=0,
                grid=(num_row_tiles, num_k),
                in_specs=[
                    pl.BlockSpec((tile_b, LANE, tile_k), lambda i, k: (i, 0, k)),
                    pl.BlockSpec((1, 1, tile_k), lambda i, k: (0, 0, k)),
                ],
                out_specs=pl.BlockSpec((tile_b, LANE), lambda i, k: (i, 0)),
                scratch_shapes=[pltpu.VMEM((tile_b, LANE, LANE), jnp.float32)],
            ),
            compiler_params=pltpu.CompilerParams(
                dimension_semantics=("parallel", "arbitrary"),
                vmem_limit_bytes=vmem_limit,
            ),
            cost_estimate=cost,
        )(y3, beta3)

    return out.reshape(n_pad)[:N]


def calc_raw_util_per_dim(Y: jax.Array, beta: jax.Array) -> jax.Array:
    """Trivial elementwise helper (Y * beta broadcast) — plain JAX glue."""
    return Y * beta.astype(Y.dtype)


if __name__ == "__main__":
    key = jax.random.PRNGKey(0)

    def check(batch, output_dim, tol):
        k_y, k_b = jax.random.split(jax.random.fold_in(key, batch * 131 + output_dim))
        Y = jax.random.normal(k_y, (batch, output_dim), dtype=jnp.float32)
        beta = jax.random.normal(k_b, (output_dim,), dtype=jnp.float32)

        fwd = jax.jit(linear_util_forward)
        util = jax.block_until_ready(fwd(Y, beta))

        # Reference (== PyTorch Y @ beta semantics), computed as an explicit f32 reduce.
        ref = jnp.sum(Y * beta, axis=-1)
        assert util.shape == (batch,)
        assert jnp.allclose(util, ref, atol=tol, rtol=tol), (batch, output_dim)

        # Elementwise helper sanity check.
        raw = calc_raw_util_per_dim(Y, beta)
        assert raw.shape == (batch, output_dim)
        assert jnp.allclose(raw.sum(axis=-1), ref, atol=1e-3, rtol=1e-3)

    # Small demo case: exercises row padding (200 -> 256) + tiny-K direct reduce.
    check(batch=200, output_dim=16, tol=1e-5)
    # Lane-folding path with two row tiles on the parallel axis.
    check(batch=2048, output_dim=256, tol=1e-4)
    # Multi-K-step accumulator path (K > 2048 -> 2 reduction steps).
    check(batch=256, output_dim=4096, tol=1e-3)

    print("KERNEL_OK")
</pallas_src>

<mosaic_0001>
module attributes {stable_mosaic.version = 11 : i64} {
  func.func @kernel(%arg0: i32, %arg1: memref<2x128x16xf32, #tpu.memory_space<vmem>>, %arg2: memref<1x1x16xf32, #tpu.memory_space<vmem>>, %arg3: memref<2x128xf32, #tpu.memory_space<vmem>>) attributes {dimension_semantics = [#tpu.dimension_semantics<parallel>], iteration_bounds = array<i64: 1>, scalar_prefetch = 0 : i64, scratch_operands = 0 : i64, tpu.core_type = #tpu.core_type<tc>, window_params = [{transform_indices = @transform_0, window_bounds = array<i64: 2, 128, 16>}, {pipeline_mode = #tpu.pipeline_mode<synchronous>, transform_indices = @transform_1, window_bounds = array<i64: 1, 1, 16>}, {transform_indices = @transform_2, window_bounds = array<i64: 2, 128>}]} {
    %c0 = arith.constant 0 : index
    %c0_0 = arith.constant 0 : index
    %c0_1 = arith.constant 0 : index
    %0 = vector.load %arg1[%c0, %c0_0, %c0_1] : memref<2x128x16xf32, #tpu.memory_space<vmem>>, vector<2x128x16xf32>
    %c0_2 = arith.constant 0 : index
    %c0_3 = arith.constant 0 : index
    %c0_4 = arith.constant 0 : index
    %1 = vector.load %arg2[%c0_2, %c0_3, %c0_4] : memref<1x1x16xf32, #tpu.memory_space<vmem>>, vector<1x1x16xf32>
    %2 = vector.broadcast %1 : vector<1x1x16xf32> to vector<2x128x16xf32>
    %3 = arith.mulf %0, %2 : vector<2x128x16xf32>
    %cst = arith.constant dense<0.000000e+00> : vector<2x128xf32>
    %4 = vector.multi_reduction <add>, %3, %cst [2] : vector<2x128x16xf32> to vector<2x128xf32>
    %c0_5 = arith.constant 0 : index
    %c0_6 = arith.constant 0 : index
    %5 = vector.load %arg3[%c0_5, %c0_6] : memref<2x128xf32, #tpu.memory_space<vmem>>, vector<2x128xf32>
    tpu.vector_store %arg3[%c0_5, %c0_6], %4 {strides = array<i32>} : memref<2x128xf32, #tpu.memory_space<vmem>>, vector<2x128xf32>,
    return
  }
  func.func @transform_0(%arg0: i32) -> (i32, i32, i32) {
    %c0_i32 = arith.constant 0 : i32
    %c0_i32_0 = arith.constant 0 : i32
    %c0_i32_1 = arith.constant 0 : i32
    return %arg0, %c0_i32, %c0_i32_0 : i32, i32, i32
  }
  func.func @transform_1(%arg0: i32) -> (i32, i32, i32) {
    %c0_i32 = arith.constant 0 : i32
    %c0_i32_0 = arith.constant 0 : i32
    %c0_i32_1 = arith.constant 0 : i32
    %c0_i32_2 = arith.constant 0 : i32
    return %c0_i32, %c0_i32_0, %c0_i32_1 : i32, i32, i32
  }
  func.func @transform_2(%arg0: i32) -> (i32, i32) {
    %c0_i32 = arith.constant 0 : i32
    %c0_i32_0 = arith.constant 0 : i32
    return %arg0, %c0_i32 : i32, i32
  }
}

</mosaic_0001>

<bundles_post_ra>
// kernel: linear_util_forward.1
= control target key start
LH: loop header
LB: loop body
LE: loop exit
PB: predicated region body
PF: predicated region fallthrough
CT: control target
= control target key end

     0   :  { %vm83_vm0 = vcmask 130048   ;;  %s769_s0 = inlined_call_operand.vmem [shape: f32[2,128,16], index: 0, kind: input, shape index: {}]   ;;  %s770_s1 = inlined_call_operand.vmem [shape: f32[1,1,16], index: 1, kind: input, shape index: {}]   ;;  %s771_s2 = inlined_call_operand.hbm [shape: f32[2,128], index: 2, kind: output, shape index: {}]  }
   0x1   :  { %v28_v0 = vld [vmem:[%s769_s0 + $0x80] sm:$0xff]  ;;  %v29_v5 = vld [vmem:[%s769_s0 + $0x88] sm:$0xff]  ;;  %v30_v9 = vld [vmem:[%s769_s0 + $0x90] sm:$0xff] }
   0x2   :  { %v468_v1 = vld [vmem:[%s770_s1] ss:$0 sm:$0xff]  ;;  %v13_v6 = vld [vmem:[%s769_s0 + $0x8] sm:$0xff]  ;;  %v14_v10 = vld [vmem:[%s769_s0 + $0x10] sm:$0xff] }
   0x3   :  { %v12_v2 = vld [vmem:[%s769_s0] sm:$0xff]  ;;  %v67_v3 = vmul.f32 %v468_v1, %v28_v0  ;;  %v68_v7 = vmul.f32 %v468_v1, %v29_v5  ;;  %v52_v8 = vmul.f32 %v468_v1, %v13_v6  ;;  %v69_v15 = vmul.f32 %v468_v1, %v30_v9  ;;  %v31_v17 = vld [vmem:[%s769_s0 + $0x98] sm:$0xff] }
   0x4   :  { %v51_v4 = vmul.f32 %v468_v1, %v12_v2  ;;  %v53_v16 = vmul.f32 %v468_v1, %v14_v10  ;;  %v15_v18 = vld [vmem:[%s769_s0 + $0x18] sm:$0xff]  ;;  %v70_v21 = vmul.f32 %v468_v1, %v31_v17  ;;  %v32_v23 = vld [vmem:[%s769_s0 + $0xa0] sm:$0xff] }
   0x5   :  { %v132_v11 = vsel %vm83_vm0, %v67_v3, 0.0  ;;  %v135_v13 = vsel %vm83_vm0, %v68_v7, 0.0  ;;  %v87_v14 = vsel %vm83_vm0, %v52_v8, 0.0  ;;  %v138_v19 = vsel %vm83_vm0, %v69_v15, 0.0  ;;  %v16_v24 = vld [vmem:[%s769_s0 + $0x20] sm:$0xff] }
   0x6   :  { %v84_v12 = vsel %vm83_vm0, %v51_v4, 0.0  ;;  %133 = vadd.xlane.f32.xlu1 %v132_v11  ;;  %v90_v20 = vsel %vm83_vm0, %v53_v16, 0.0  ;;  %v54_v22 = vmul.f32 %v468_v1, %v15_v18 }
   0x7   :  { %85 = vadd.xlane.f32.xlu0 %v84_v12 }
   0xa   :  { %136 = vadd.xlane.f32.xlu1 %v135_v13 }
   0xb   :  { %88 = vadd.xlane.f32.xlu0 %v87_v14 }
   0xc   :  { %7 = vsyncpa [#allocation3], 0  ;;  %v141_v25 = vsel %vm83_vm0, %v70_v21, 0.0  ;;  %v93_v26 = vsel %vm83_vm0, %v54_v22, 0.0  ;;  %v71_v27 = vmul.f32 %v468_v1, %v32_v23  ;;  %v55_v28 = vmul.f32 %v468_v1, %v16_v24  ;;  %v33_v29 = vld [vmem:[%s769_s0 + $0xa8] sm:$0xff]  ;;  %v34_v35 = vld [vmem:[%s769_s0 + $0xb0] sm:$0xff] }
   0xd   :  { %v17_v30 = vld [vmem:[%s769_s0 + $0x28] sm:$0xff]  ;;  %v72_v33 = vmul.f32 %v468_v1, %v33_v29  ;;  %v18_v36 = vld [vmem:[%s769_s0 + $0x30] sm:$0xff]  ;;  %v73_v39 = vmul.f32 %v468_v1, %v34_v35  ;;  %v35_v41 = vld [vmem:[%s769_s0 + $0xb8] sm:$0xff]  ;;  %vm223_vm1 = vcmask 130112   ;;  %vm230_vm2 = vcmask 195712  }
   0xe   :  { %139 = vadd.xlane.f32.xlu1 %v138_v19  ;;  %v144_v31 = vsel %vm83_vm0, %v71_v27, 0.0  ;;  %v96_v32 = vsel %vm83_vm0, %v55_v28, 0.0  ;;  %v56_v34 = vmul.f32 %v468_v1, %v17_v30  ;;  %v57_v40 = vmul.f32 %v468_v1, %v18_v36  ;;  %v19_v42 = vld [vmem:[%s769_s0 + $0x38] sm:$0xff]  ;;  %v36_v47 = vld [vmem:[%s769_s0 + $0xc0] sm:$0xff]  ;;  %v37_v53 = vld [vmem:[%s769_s0 + $0xc8] sm:$0xff] }
   0xf   :  { %91 = vadd.xlane.f32.xlu0 %v90_v20  ;;  %v147_v37 = vsel %vm83_vm0, %v72_v33, 0.0  ;;  %v150_v43 = vsel %vm83_vm0, %v73_v39, 0.0  ;;  %v74_v45 = vmul.f32 %v468_v1, %v35_v41  ;;  %v58_v46 = vmul.f32 %v468_v1, %v19_v42  ;;  %v20_v48 = vld [vmem:[%s769_s0 + $0x40] sm:$0xff]  ;;  %v21_v54 = vld [vmem:[%s769_s0 + $0x48] sm:$0xff]  ;;  %v38_v59 = vld [vmem:[%s769_s0 + $0xd0] sm:$0xff] }
  0x10   :  { %v99_v38 = vsel %vm83_vm0, %v56_v34, 0.0  ;;  %v102_v44 = vsel %vm83_vm0, %v57_v40, 0.0  ;;  %v75_v51 = vmul.f32 %v468_v1, %v36_v47  ;;  %v59_v52 = vmul.f32 %v468_v1, %v20_v48  ;;  %v22_v60 = vld [vmem:[%s769_s0 + $0x50] sm:$0xff]  ;;  %v39_v2 = vld [vmem:[%s769_s0 + $0xd8] sm:$0xff]  ;;  %v40_v8 = vld [vmem:[%s769_s0 + $0xe0] sm:$0xff] }
  0x11   :  { %v153_v49 = vsel %vm83_vm0, %v74_v45, 0.0  ;;  %v105_v50 = vsel %vm83_vm0, %v58_v46, 0.0  ;;  %v76_v57 = vmul.f32 %v468_v1, %v37_v53  ;;  %v60_v58 = vmul.f32 %v468_v1, %v21_v54  ;;  %v23_v3 = vld [vmem:[%s769_s0 + $0x58] sm:$0xff]  ;;  %v24_v9 = vld [vmem:[%s769_s0 + $0x60] sm:$0xff]  ;;  %v41_v14 = vld [vmem:[%s769_s0 + $0xe8] sm:$0xff] }
  0x12   :  { %142 = vadd.xlane.f32.xlu1 %v141_v25  ;;  %v156_v55 = vsel %vm83_vm0, %v75_v51, 0.0  ;;  %v108_v56 = vsel %vm83_vm0, %v59_v52, 0.0  ;;  %v77_v63 = vmul.f32 %v468_v1, %v38_v59  ;;  %v61_v0 = vmul.f32 %v468_v1, %v22_v60  ;;  %v25_v15 = vld [vmem:[%s769_s0 + $0x68] sm:$0xff]  ;;  %v42_v20 = vld [vmem:[%s769_s0 + $0xf0] sm:$0xff]  ;;  %v27_v27 = vld [vmem:[%s769_s0 + $0x78] sm:$0xff] }
  0x13   :  { %94 = vadd.xlane.f32.xlu0 %v93_v26  ;;  %v159_v61 = vsel %vm83_vm0, %v76_v57, 0.0  ;;  %v111_v62 = vsel %vm83_vm0, %v60_v58, 0.0  ;;  %v78_v6 = vmul.f32 %v468_v1, %v39_v2  ;;  %v62_v7 = vmul.f32 %v468_v1, %v23_v3  ;;  %v26_v21 = vld [vmem:[%s769_s0 + $0x70] sm:$0xff]  ;;  %v43_v26 = vld [vmem:[%s769_s0 + $0xf8] sm:$0xff]  ;;  %s446_s0 = smov [#allocation2]  }
  0x14   :  { %v162_v4 = vsel %vm83_vm0, %v77_v63, 0.0  ;;  %v114_v5 = vsel %vm83_vm0, %v61_v0, 0.0  ;;  %v79_v12 = vmul.f32 %v468_v1, %v40_v8  ;;  %v63_v13 = vmul.f32 %v468_v1, %v24_v9  ;;  %s412_s17 = sshll.u32 %s446_s0, 4  ;;  %s413_s17 = int_to_ptr.vmem [resolvable:$true] %s412_s17 }
  0x15   :  { %v165_v10 = vsel %vm83_vm0, %v78_v6, 0.0  ;;  %v117_v11 = vsel %vm83_vm0, %v62_v7, 0.0  ;;  %v80_v18 = vmul.f32 %v468_v1, %v41_v14  ;;  %v64_v19 = vmul.f32 %v468_v1, %v25_v15  ;;  %s422_s18 = scalar_lea.vmem %s413_s17, 32  ;;  %p427_p1 = scmp.lt.s32.totalorder %s413_s17, %s413_s17 }
  0x16   :  { %145 = vadd.xlane.f32.xlu1 %v144_v31  ;;  %v168_v16 = vsel %vm83_vm0, %v79_v12, 0.0  ;;  %v120_v17 = vsel %vm83_vm0, %v63_v13, 0.0  ;;  %v81_v24 = vmul.f32 %v468_v1, %v42_v20  ;;  %v65_v25 = vmul.f32 %v468_v1, %v26_v21  ;;  %p423_p0 = scmp.ne.s32.totalorder %s413_s17, %s422_s18  ;;  %p428_p2 = scmp.lt.s32.totalorder %s422_s18, %s422_s18 }
  0x17   :  { %97 = vadd.xlane.f32.xlu0 %v96_v32  ;;  %v171_v22 = vsel %vm83_vm0, %v80_v18, 0.0  ;;  %v123_v23 = vsel %vm83_vm0, %v64_v19, 0.0  ;;  %v82_v30 = vmul.f32 %v468_v1, %v43_v26  ;;  %v66_v31 = vmul.f32 %v468_v1, %v27_v27 }
  0x18   :  { %v174_v28 = vsel %vm83_vm0, %v81_v24, 0.0  ;;  %v126_v29 = vsel %vm83_vm0, %v65_v25, 0.0  ;;  %vm237_vm3 = vcmask 261312   ;;  %vm244_vm4 = vcmask 326912   ;;  %p429_p3 = por %p428_p2, %p427_p1 }
  0x19   :  { %v177_v32 = vsel %vm83_vm0, %v82_v30, 0.0  ;;  %v129_v33 = vsel %vm83_vm0, %v66_v31, 0.0  ;;  %vm251_vm5 = vcmask 392512   ;;  %vm258_vm6 = vcmask 458112  }
  0x1a   :  { %148 = vadd.xlane.f32.xlu1 %v147_v37  ;;  %vm265_vm7 = vcmask 523712   ;;  %vm272_vm8 = vcmask 589312   ;;  %vm279_vm9 = vcmask 654912   ;;  %vm286_vm10 = vcmask 720512   ;;  %p430_p4 = pnand %p429_p3, %p423_p0 }
  0x1b   :  { %100 = vadd.xlane.f32.xlu0 %v99_v38  ;;  %vm293_vm11 = vcmask 786112   ;;  %vm300_vm12 = vcmask 851712   ;;  %vm307_vm13 = vcmask 917312   ;;  %vm314_vm14 = vcmask 982912  }
  0x1c   :  { %vm321_vm15 = vcmask 1048512   ;;  %vm402_vm0 = vcmask 1041409  }
  0x1e   :  { %151 = vadd.xlane.f32.xlu1 %v150_v43 }
  0x1f   :  { %103 = vadd.xlane.f32.xlu0 %v102_v44 }
  0x22   :  { %154 = vadd.xlane.f32.xlu1 %v153_v49  ;;  %v212_v49 = vlaneseq }
  0x23   :  { %106 = vadd.xlane.f32.xlu0 %v105_v50 }
  0x24   :  { %v213_v52 = vand.u32 127, %v212_v49  ;;  %v215_v53 = vshrl.u32 %v212_v49, 7 }
  0x26   :  { %157 = vadd.xlane.f32.xlu1 %v156_v55  ;;  %v218_v54 = vadd.s32 4294967288, %v213_v52  ;;  %v225_v55 = vadd.s32 4294967280, %v213_v52  ;;  %v239_v59 = vadd.s32 4294967264, %v213_v52  ;;  %v216_v60 = vsub.s32 %v213_v52, %v215_v53 }
  0x27   :  { %109 = vadd.xlane.f32.xlu0 %v108_v56  ;;  %v232_v56 = vadd.s32 4294967272, %v213_v52  ;;  %v253_v0 = vadd.s32 4294967248, %v213_v52  ;;  %v260_v2 = vadd.s32 4294967240, %v213_v52  ;;  %v281_v9 = vadd.s32 4294967216, %v213_v52 }
  0x28   :  { %v228_v63 = vsub.s32 %v225_v55, %v215_v53  ;;  %v242_v8 = vsub.s32 %v239_v59, %v215_v53  ;;  %v295_v12 = vadd.s32 4294967200, %v213_v52  ;;  %v302_v13 = vadd.s32 4294967192, %v213_v52 }
  0x29   :  { %v235_v3 = vsub.s32 %v232_v56, %v215_v53  ;;  %v256_v14 = vsub.s32 %v253_v0, %v215_v53  ;;  %v263_v15 = vsub.s32 %v260_v2, %v215_v53  ;;  %v309_v20 = vadd.s32 4294967184, %v213_v52 }
  0x2a   :  { %160 = vadd.xlane.f32.xlu1 %v159_v61  ;;  %v246_v61 = vadd.s32 4294967256, %v213_v52  ;;  %v316_v21 = vadd.s32 4294967176, %v213_v52  ;;  %v681_v24 = vsub.s32 %v281_v9, %v215_v53 }
  0x2b   :  { %112 = vadd.xlane.f32.xlu0 %v111_v62  ;;  %v221_v62 = vsub.s32 %v218_v54, %v215_v53  ;;  %v697_v49 = vsub.s32 %v309_v20, %v215_v53 }
  0x2e   :  { %163 = vadd.xlane.f32.xlu1 %v162_v4  ;;  %v267_v4 = vadd.s32 4294967232, %v213_v52 }
  0x2f   :  { %115 = vadd.xlane.f32.xlu0 %v114_v5  ;;  %v274_v5 = vadd.s32 4294967224, %v213_v52 }
  0x32   :  { %166 = vadd.xlane.f32.xlu1 %v165_v10  ;;  %v288_v10 = vadd.s32 4294967208, %v213_v52  ;;  %v699_v52 = vsub.s32 %v316_v21, %v215_v53 }
  0x33   :  { %118 = vadd.xlane.f32.xlu0 %v117_v11  ;;  %v249_v11 = vsub.s32 %v246_v61, %v215_v53 }
  0x34   :  { %v683_v25 = vsub.s32 %v288_v10, %v215_v53 }
  0x36   :  { %169 = vadd.xlane.f32.xlu1 %v168_v16  ;;  %v671_v16 = vsub.s32 %v267_v4, %v215_v53 }
  0x37   :  { %121 = vadd.xlane.f32.xlu0 %v120_v17  ;;  %v673_v17 = vsub.s32 %v274_v5, %v215_v53 }
  0x3a   :  { %172 = vadd.xlane.f32.xlu1 %v171_v22 }
  0x3b   :  { %124 = vadd.xlane.f32.xlu0 %v123_v23 }
  0x3e   :  { %175 = vadd.xlane.f32.xlu1 %v174_v28  ;;  %v687_v28 = vsub.s32 %v295_v12, %v215_v53 }
  0x3f   :  { %127 = vadd.xlane.f32.xlu0 %v126_v29  ;;  %v689_v29 = vsub.s32 %v302_v13, %v215_v53 }
  0x42   :  { %178 = vadd.xlane.f32.xlu1 %v177_v32 }
  0x43   :  { %130 = vadd.xlane.f32.xlu0 %v129_v33 }
  0x93   :  { %v627_v34 = vpop.xlane.xlu1 %133 }
  0x94   :  { %v629_v35 = vpop.xlane.xlu0 %85  ;;  %v326_v30 = vrot.slane %v627_v34, %v216_v60 }
  0x95   :  { %v217_v31 = vrot.slane %v629_v35, %v216_v60 }
  0x97   :  { %v631_v36 = vpop.xlane.xlu1 %136 }
  0x98   :  { %v633_v37 = vpop.xlane.xlu0 %88  ;;  %v330_v22 = vrot.slane %v631_v36, %v221_v62 }
  0x99   :  { %v222_v23 = vrot.slane %v633_v37, %v221_v62 }
  0x9a   :  { %v331_v34 = vsel %vm223_vm1, %v330_v22, %v326_v30 }
  0x9b   :  { %v635_v38 = vpop.xlane.xlu1 %139  ;;  %v224_v35 = vsel %vm223_vm1, %v222_v23, %v217_v31 }
  0x9c   :  { %v637_v39 = vpop.xlane.xlu0 %91  ;;  %v335_v26 = vrot.slane %v635_v38, %v228_v63 }
  0x9d   :  { %v229_v27 = vrot.slane %v637_v39, %v228_v63 }
  0x9f   :  { %v639_v1 = vpop.xlane.xlu1 %142 }
  0xa0   :  { %v641_v40 = vpop.xlane.xlu0 %94  ;;  %v340_v32 = vrot.slane %v639_v1, %v235_v3 }
  0xa1   :  { %v236_v33 = vrot.slane %v641_v40, %v235_v3 }
  0xa3   :  { %v643_v41 = vpop.xlane.xlu1 %145 }
  0xa4   :  { %v645_v42 = vpop.xlane.xlu0 %97  ;;  %v345_v36 = vrot.slane %v643_v41, %v242_v8  ;;  %v336_v41 = vsel %vm230_vm2, %v335_v26, %v331_v34 }
  0xa5   :  { %v243_v37 = vrot.slane %v645_v42, %v242_v8  ;;  %v231_v42 = vsel %vm230_vm2, %v229_v27, %v224_v35  ;;  %v341_v53 = vsel %vm237_vm3, %v340_v32, %v336_v41 }
  0xa6   :  { %v238_v56 = vsel %vm237_vm3, %v236_v33, %v231_v42 }
  0xa7   :  { %v647_v43 = vpop.xlane.xlu1 %148  ;;  %v245_v60 = vsel %vm244_vm4, %v243_v37, %v238_v56 }
  0xa8   :  { %v649_v44 = vpop.xlane.xlu0 %100  ;;  %v350_v1 = vrot.slane %v647_v43, %v249_v11 }
  0xa9   :  { %v250_v40 = vrot.slane %v649_v44, %v249_v11  ;;  %v346_v44 = vsel %vm244_vm4, %v345_v36, %v341_v53 }
  0xaa   :  { %v351_v63 = vsel %vm251_vm5, %v350_v1, %v346_v44 }
  0xab   :  { %v651_v45 = vpop.xlane.xlu1 %151  ;;  %v252_v0 = vsel %vm251_vm5, %v250_v40, %v245_v60 }
  0xac   :  { %v653_v46 = vpop.xlane.xlu0 %103  ;;  %v355_v54 = vrot.slane %v651_v45, %v256_v14 }
  0xad   :  { %v257_v55 = vrot.slane %v653_v46, %v256_v14 }
  0xae   :  { %v356_v2 = vsel %vm258_vm6, %v355_v54, %v351_v63 }
  0xaf   :  { %v655_v47 = vpop.xlane.xlu1 %154  ;;  %v259_v3 = vsel %vm258_vm6, %v257_v55, %v252_v0 }
  0xb0   :  { %v657_v48 = vpop.xlane.xlu0 %106  ;;  %v360_v59 = vrot.slane %v655_v47, %v263_v15 }
  0xb1   :  { %v264_v43 = vrot.slane %v657_v48, %v263_v15 }
  0xb2   :  { %v361_v4 = vsel %vm265_vm7, %v360_v59, %v356_v2 }
  0xb3   :  { %v659_v50 = vpop.xlane.xlu1 %157  ;;  %v266_v5 = vsel %vm265_vm7, %v264_v43, %v259_v3 }
  0xb4   :  { %v661_v51 = vpop.xlane.xlu0 %109  ;;  %v365_v61 = vrot.slane %v659_v50, %v671_v16 }
  0xb5   :  { %v271_v45 = vrot.slane %v661_v51, %v671_v16 }
  0xb6   :  { %v366_v8 = vsel %vm272_vm8, %v365_v61, %v361_v4 }
  0xb7   :  { %v663_v57 = vpop.xlane.xlu1 %160  ;;  %v273_v9 = vsel %vm272_vm8, %v271_v45, %v266_v5 }
  0xb8   :  { %v665_v58 = vpop.xlane.xlu0 %112  ;;  %v370_v47 = vrot.slane %v663_v57, %v673_v17 }
  0xb9   :  { %v278_v48 = vrot.slane %v665_v58, %v673_v17 }
  0xba   :  { %v371_v12 = vsel %vm279_vm9, %v370_v47, %v366_v8 }
  0xbb   :  { %v667_v6 = vpop.xlane.xlu1 %163  ;;  %v280_v13 = vsel %vm279_vm9, %v278_v48, %v273_v9 }
  0xbc   :  { %v669_v7 = vpop.xlane.xlu0 %115  ;;  %v375_v50 = vrot.slane %v667_v6, %v681_v24 }
  0xbd   :  { %v285_v51 = vrot.slane %v669_v7, %v681_v24 }
  0xbe   :  { %v376_v16 = vsel %vm286_vm10, %v375_v50, %v371_v12 }
  0xbf   :  { %v675_v18 = vpop.xlane.xlu1 %166  ;;  %v287_v17 = vsel %vm286_vm10, %v285_v51, %v280_v13 }
  0xc0   :  { %v677_v19 = vpop.xlane.xlu0 %118  ;;  %v380_v57 = vrot.slane %v675_v18, %v683_v25 }
  0xc1   :  { %v292_v58 = vrot.slane %v677_v19, %v683_v25 }
  0xc2   :  { %v381_v20 = vsel %vm293_vm11, %v380_v57, %v376_v16 }
  0xc3   :  { %v170_v38 = vpop.xlane.xlu1 %169  ;;  %v294_v21 = vsel %vm293_vm11, %v292_v58, %v287_v17 }
  0xc4   :  { %v122_v39 = vpop.xlane.xlu0 %121  ;;  %v385_v10 = vrot.slane %v170_v38, %v687_v28 }
  0xc5   :  { %v299_v6 = vrot.slane %v122_v39, %v687_v28 }
  0xc6   :  { %v386_v22 = vsel %vm300_vm12, %v385_v10, %v381_v20 }
  0xc7   :  { %v173_v46 = vpop.xlane.xlu1 %172  ;;  %v301_v23 = vsel %vm300_vm12, %v299_v6, %v294_v21 }
  0xc8   :  { %v125_v62 = vpop.xlane.xlu0 %124  ;;  %v390_v14 = vrot.slane %v173_v46, %v689_v29 }
  0xc9   :  { %v306_v15 = vrot.slane %v125_v62, %v689_v29 }
  0xca   :  { %v391_v26 = vsel %vm307_vm13, %v390_v14, %v386_v22 }
  0xcb   :  { %v176_v11 = vpop.xlane.xlu1 %175  ;;  %v308_v27 = vsel %vm307_vm13, %v306_v15, %v301_v23 }
  0xcc   :  { %v128_v7 = vpop.xlane.xlu0 %127  ;;  %v395_v18 = vrot.slane %v176_v11, %v697_v49 }
  0xcd   :  { %v313_v19 = vrot.slane %v128_v7, %v697_v49 }
  0xce   :  { %v396_v30 = vsel %vm314_vm14, %v395_v18, %v391_v26 }
  0xcf   :  { %v179_v24 = vpop.xlane.xlu1 %178  ;;  %v315_v31 = vsel %vm314_vm14, %v313_v19, %v308_v27 }
  0xd0   :  { %v131_v25 = vpop.xlane.xlu0 %130  ;;  %v400_v28 = vrot.slane %v179_v24, %v699_v52 }
  0xd1   :  { %v320_v29 = vrot.slane %v131_v25, %v699_v52 }
  0xd2   :  { %v401_v33 = vsel %vm321_vm15, %v400_v28, %v396_v30 }
  0xd3   :  { %v322_v32 = vsel %vm321_vm15, %v320_v29, %v315_v31 }
  0xd4   :  { %v403_v36 = vsel %vm402_vm0, %v401_v33, %v322_v32 }
  0xd5   :  { %405 = vst [vmem:[#allocation2] sm:$0x3] %v403_v36 }
  0xd6   :  { %433 = shalt.err (!%p430_p4)
}
  0xd7   :  { %s434_s20 = scalar_lea.hbm %s771_s2, 32 }
  0xd8   :  { %p435_p5 = scmp.ne.s32.totalorder %s771_s2, %s434_s20  ;;  %p438_p6 = scmp.lt.u32.totalorder %s434_s20, %s771_s2 }
  0xda   :  { %p440_p7 = pnand %p438_p6, %p435_p5 }
  0xdc   :  { %443 = shalt.err (!%p440_p7)
}
  0xdd   :  { %415 = dma.vmem_to_hbm [thread:$0]  %s413_s17, 32, %s771_s2, [#allocation3]  }
  0xde   :  { %444 = dma.done.wait [#allocation3], 32  }
  0xdf   :  { %445 = vsyncadd [#allocation3], 4294967264 }
  0xe0   :  { %419 = vsyncpa [#allocation3], 1 }

</bundles_post_ra>
